<compile_context>
chip_gen: v5e
topology: v5e:2x2
jax: 0.10.0
libtpu: 0.0.40
codegen_flags: <defaults>
</compile_context>

<pallas_src>
import functools
import math

import jax
import jax.numpy as jnp
from jax import lax
from jax.experimental import pallas as pl
from jax.experimental.pallas import tpu as pltpu


# --------------------------- hardware parameters -----------------------------

def _tpu_params():
    """Return (vmem_tile_budget_bytes, vmem_limit_bytes, num_tensorcores)."""
    vmem_bytes = 64 * 1024 * 1024            # conservative default (v7x-sized)
    num_cores = 1
    try:
        info = pltpu.get_tpu_info()
        for name in ("vmem_capacity_bytes", "vmem_bytes", "vmem_size_bytes"):
            v = getattr(info, name, None)
            if isinstance(v, int) and v > 0:
                vmem_bytes = v
                break
        for name in ("num_cores", "num_tensorcores", "tensorcores_per_chip",
                     "core_count", "num_tensor_cores"):
            v = getattr(info, name, None)
            if isinstance(v, int) and v > 0:
                num_cores = v
                break
    except Exception:  # query is best-effort only
        pass
    budget = (vmem_bytes * 13) // 20         # ~65%: live double-buffered tiles
    limit = (vmem_bytes * 17) // 20          # ~85%: leave Mosaic scratch room
    return budget, limit, num_cores


_HIGHEST_PRECISION_OK = None  # lazily resolved (True / False)


def _f32_dot_precision():
    """lax.Precision.HIGHEST if this Mosaic build accepts an explicit matmul
    precision (exact f32, matching the module's exact-multiplication
    semantics), otherwise None (compiler default)."""
    global _HIGHEST_PRECISION_OK
    if _HIGHEST_PRECISION_OK is None:
        def _probe_kernel(a_ref, b_ref, o_ref):
            o_ref[...] = lax.dot_general(
                a_ref[...], b_ref[...],
                dimension_numbers=(((1,), (1,)), ((), ())),
                preferred_element_type=jnp.float32,
                precision=lax.Precision.HIGHEST)
        try:
            x = jnp.ones((8, 128), jnp.float32)
            jax.block_until_ready(
                pl.pallas_call(
                    _probe_kernel,
                    out_shape=jax.ShapeDtypeStruct((8, 8), jnp.float32))(x, x))
            _HIGHEST_PRECISION_OK = True
        except Exception:
            # TODO(synk): this Mosaic build rejects an explicit matmul
            # precision; fall back to the default f32 MXU matmul.
            _HIGHEST_PRECISION_OK = False
    return lax.Precision.HIGHEST if _HIGHEST_PRECISION_OK else None


# ------------------------------ Pallas kernels -------------------------------

# out[c, hw] = sum_k w[c, k] * a[hw, k]  ("NT" contraction on the MXU).
_NT_DIMS = (((1,), (1,)), ((), ()))


def _conv_mm_kernel(a_ref, w_ref, bias_ref, o_ref, *, precision):
    """Single-reduction-step kernel: one dot, fused bias, direct store.

    a: (thw, K), w: (C_out, K), bias: (C_out, 1) -> o: (C_out, thw)."""
    o_ref[...] = (
        lax.dot_general(w_ref[...], a_ref[...], _NT_DIMS,
                        preferred_element_type=jnp.float32,
                        precision=precision)
        + bias_ref[...]
    ).astype(o_ref.dtype)


def _conv_mm_kernel_ktiled(a_ref, w_ref, bias_ref, o_ref, acc_ref, *,
                           tk, k_rem, precision):
    """K-tiled kernel: f32 VMEM accumulator; the whole folded weight matrix is
    resident in VMEM and sliced in-kernel (fetched once, not per (i, k) step);
    the ragged last K step of the patch tile is masked instead of padding the
    big patch matrix in HBM."""
    k = pl.program_id(2)

    @pl.when(k == 0)
    def _init():
        acc_ref[...] = jnp.zeros_like(acc_ref)

    a = a_ref[...]
    if k_rem:  # static: K % tk != 0 -> zero the stale lanes of the last tile
        lane = lax.broadcasted_iota(jnp.int32, a.shape, 1)
        valid = jnp.where(k == pl.num_programs(2) - 1, k_rem, tk)
        a = jnp.where(lane < valid, a, jnp.zeros_like(a))

    start = pl.multiple_of(k * tk, 128)
    acc_ref[...] += lax.dot_general(
        w_ref[:, pl.ds(start, tk)], a, _NT_DIMS,
        preferred_element_type=jnp.float32, precision=precision)

    @pl.when(k == pl.num_programs(2) - 1)
    def _finalize():
        o_ref[...] = (acc_ref[...] + bias_ref[...]).astype(o_ref.dtype)


# ------------------------------ tile planning --------------------------------

def _plan_tiles(Nb, HW, K, C_out, bytes_budget, num_cores):
    """Pick (thw, tk, k_steps): thw is the spatial (lane) tile of the output,
    tk the K reduction tile (k_steps == 1 -> single-step fast path)."""

    def footprint(thw, tk, k_steps):
        acc = C_out * thw if k_steps > 1 else 0
        k_res = tk * k_steps                    # resident folded-weight cols
        return 4 * (2 * thw * tk                # double-buffered patch tiles
                    + 2 * C_out * k_res         # resident weights
                    + 2 * C_out * thw           # double-buffered output tiles
                    + 2 * C_out                 # bias
                    + acc)                      # accumulator scratch

    # Spatial tile candidates: full HW first (fewest grid steps, no masked
    # rows), then multiples of 128 (lane-dense output stores).
    cands = [HW] if HW <= 2048 else []
    cands += [t for t in (1024, 512, 256, 128) if t < HW]
    if not cands:
        cands = [HW]

    # v7x megacore: make sure the parallel grid (Nb * hw_tiles) can feed every
    # TensorCore; on single-TC chips (v5e/v6e) keep the biggest tile (no
    # useless split that only adds grid-step overhead).
    if num_cores >= 2 and Nb < num_cores:
        split = [t for t in cands if pl.cdiv(HW, t) >= num_cores]
        if split:
            cands = split

    # Path 1: all of K resident -> single reduction step (no scratch/phases).
    for thw in cands:
        if footprint(thw, K, 1) <= bytes_budget:
            return thw, K, 1

    # Path 2: tile K.  Prefer a 128-multiple divisor of K (no padding, no
    # masking anywhere); otherwise the largest fitting 128-multiple with a
    # masked ragged last step.  The big patch matrix is never padded in HBM.
    thw = cands[-1]
    tk = 128
    for cand in (2048, 1024, 512, 256, 128):
        if cand < K and footprint(thw, cand, pl.cdiv(K, cand)) <= bytes_budget:
            tk = cand
            break
    for div in range(tk, 127, -128):
        if K % div == 0:
            tk = div
            break
    # TODO(synk): if even (thw=128, tk=128) with resident weights exceeds the
    # budget (pathologically large C_out*K), stream the weight slab per K step.
    k_steps = pl.cdiv(K, tk)
    if k_steps <= 1:
        return thw, K, 1
    return thw, tk, k_steps


# ------------------------------ pallas wrapper --------------------------------

def _pallas_conv_matmul(a, w, bias):
    """a: (Nb, HW, K) patches, w: (C_out, K) folded weights, bias: (C_out,)
    -> (Nb, C_out, HW) f32 = einsum('nhk,ck->nch', a, w) + bias, on the MXU."""
    Nb, HW, K = a.shape
    C_out, K2 = w.shape
    assert K == K2

    budget, vmem_limit, num_cores = _tpu_params()
    thw, tk, k_steps = _plan_tiles(Nb, HW, K, C_out, budget, num_cores)

    precision = _f32_dot_precision() if a.dtype == jnp.float32 else None
    bias2d = bias.astype(jnp.float32).reshape(C_out, 1)

    cost = pl.CostEstimate(
        flops=2 * Nb * HW * K * C_out,
        transcendentals=0,
        bytes_accessed=(a.size * a.dtype.itemsize + w.size * w.dtype.itemsize
                        + 4 * (Nb * C_out * HW + C_out)))

    n_hw = pl.cdiv(HW, thw)
    out_shape = jax.ShapeDtypeStruct((Nb, C_out, HW), jnp.float32)

    if k_steps == 1:
        grid = (Nb, n_hw)
        kernel = functools.partial(_conv_mm_kernel, precision=precision)
        in_specs = [
            pl.BlockSpec((None, thw, K), lambda n, i: (n, i, 0)),   # patches
            pl.BlockSpec((C_out, K), lambda n, i: (0, 0)),          # weights
            pl.BlockSpec((C_out, 1), lambda n, i: (0, 0)),          # bias
        ]
        out_spec = pl.BlockSpec((None, C_out, thw), lambda n, i: (n, 0, i))
        scratch = []
        dims = ("parallel", "parallel")
    else:
        K_pad = tk * k_steps
        k_rem = (K - (k_steps - 1) * tk) if (K % tk) else 0
        if K_pad != K:
            # Only the small folded weight matrix is padded; the big patch
            # matrix is handled with an in-kernel mask on the last K step.
            w = jnp.pad(w, ((0, 0), (0, K_pad - K)))
        grid = (Nb, n_hw, k_steps)
        kernel = functools.partial(_conv_mm_kernel_ktiled,
                                   tk=tk, k_rem=k_rem, precision=precision)
        in_specs = [
            pl.BlockSpec((None, thw, tk), lambda n, i, k: (n, i, k)),
            pl.BlockSpec((C_out, K_pad), lambda n, i, k: (0, 0)),   # resident
            pl.BlockSpec((C_out, 1), lambda n, i, k: (0, 0)),
        ]
        out_spec = pl.BlockSpec((None, C_out, thw), lambda n, i, k: (n, 0, i))
        scratch = [pltpu.VMEM((C_out, thw), jnp.float32)]
        dims = ("parallel", "parallel", "arbitrary")

    return pl.pallas_call(
        kernel,
        out_shape=out_shape,
        grid_spec=pltpu.PrefetchScalarGridSpec(
            num_scalar_prefetch=0,
            grid=grid,
            in_specs=in_specs,
            out_specs=out_spec,
            scratch_shapes=scratch),
        compiler_params=pltpu.CompilerParams(
            dimension_semantics=dims,
            vmem_limit_bytes=vmem_limit),
        cost_estimate=cost,
    )(a, w, bias2d)


# -------------------------------- JAX module ----------------------------------

class Conv2dApproximationJAX:
    """JAX/Pallas port of Conv2dApproximation (exact-multiplication path)."""

    def __init__(self, in_channels, out_channels, kernel_size,
                 stride=(1, 1), padding=(0, 0), dilation=(1, 1),
                 bias=True, cast_operands_to_bf16=False, key=None):
        assert key is not None
        KH, KW = kernel_size
        self.in_channels = in_channels
        self.out_channels = out_channels
        self.kernel_size = tuple(kernel_size)
        self.stride = tuple(stride)
        self.padding = tuple(padding)
        self.dilation = tuple(dilation)
        # TODO(synk): bf16 MXU operands (f32 accumulation) are much faster on
        # v6e/v7x but relax the exact-multiplication semantics; off by default.
        self.cast_operands_to_bf16 = cast_operands_to_bf16

        # kaiming_uniform_(a=sqrt(5)) => bound = 1/sqrt(fan_in); same for bias.
        fan_in = in_channels * KH * KW
        bound = 1.0 / math.sqrt(fan_in)
        k_w, k_b = jax.random.split(key)
        self.weights = jax.random.uniform(
            k_w, (out_channels, in_channels, KH, KW),
            dtype=jnp.float32, minval=-bound, maxval=bound)
        if bias:
            self.bias = jax.random.uniform(
                k_b, (out_channels,), dtype=jnp.float32,
                minval=-bound, maxval=bound)
        else:
            self.bias = None

    def __call__(self, x):
        assert x.ndim == 4  # NCHW, float32
        ph, pw = self.padding

        # im2col as ONE fused XLA op -> (Nb, H_out, W_out, C_in*KH*KW), with
        # patch-channel index c*KH*KW + kh*KW + kw (identical ordering to
        # torch unfold and to weights.reshape(C_out, -1)).  HIGHEST keeps the
        # identity-kernel extraction bit-exact in f32.
        # TODO(synk): fully fusing the im2col gather into the Pallas kernel's
        # DMAs (per-(kh,kw) offsets over a resident input slab) would remove
        # ~2*KH*KW extra HBM passes over the input; not done here.
        patches = lax.conv_general_dilated_patches(
            x,
            filter_shape=self.kernel_size,
            window_strides=self.stride,
            padding=((ph, ph), (pw, pw)),
            rhs_dilation=self.dilation,
            dimension_numbers=("NCHW", "OIHW", "NHWC"),
            precision=lax.Precision.HIGHEST)
        Nb, H_out, W_out, K = patches.shape

        a = patches.reshape(Nb, H_out * W_out, K)            # free reshape
        w_fold = self.weights.reshape(self.out_channels, K)  # (C_out, K)
        bias = (self.bias if self.bias is not None
                else jnp.zeros((self.out_channels,), jnp.float32))
        if self.cast_operands_to_bf16:
            a = a.astype(jnp.bfloat16)
            w_fold = w_fold.astype(jnp.bfloat16)

        out = _pallas_conv_matmul(a, w_fold, bias)           # (Nb, C_out, HW)
        # Output is already channel-major, so NCHW is a free reshape (no
        # NHWC->NCHW transpose pass over HBM).
        return out.reshape(Nb, self.out_channels, H_out, W_out)


# ----------------------------------- main -------------------------------------

if __name__ == "__main__":
    key = jax.random.PRNGKey(0)
    k_x, k_mod = jax.random.split(key)

    N, C_in, H, W = 2, 4, 16, 16
    C_out = 8
    kernel_size = (3, 3)
    stride = (1, 1)
    padding = (1, 1)
    dilation = (1, 1)

    x = jax.random.normal(k_x, (N, C_in, H, W), dtype=jnp.float32)

    module = Conv2dApproximationJAX(
        C_in, C_out, kernel_size, stride=stride, padding=padding,
        dilation=dilation, bias=True, key=k_mod)

    out = module(x)
    out = jax.block_until_ready(out)

    # Exact-multiplication reference: XLA's native convolution at HIGHEST
    # precision (the module's approximation_enable=False semantics).
    ref = lax.conv_general_dilated(
        x, module.weights, window_strides=stride,
        padding=[(padding[0], padding[0]), (padding[1], padding[1])],
        rhs_dilation=dilation,
        dimension_numbers=("NCHW", "OIHW", "NCHW"),
        precision=lax.Precision.HIGHEST)
    ref = ref + module.bias[None, :, None, None]

    assert out.shape == (N, C_out, H, W), out.shape
    max_err = float(jnp.max(jnp.abs(out - ref)))
    assert jnp.allclose(out, ref, atol=1e-4, rtol=1e-4), max_err

    print("KERNEL_OK")
</pallas_src>

<mosaic_0001>
module attributes {stable_mosaic.version = 11 : i64} {
  func.func @_probe_kernel(%arg0: memref<8x128xf32, #tpu.memory_space<vmem>>, %arg1: memref<8x128xf32, #tpu.memory_space<vmem>>, %arg2: memref<8x8xf32, #tpu.memory_space<vmem>>) attributes {dimension_semantics = [], scalar_prefetch = 0 : i64, scratch_operands = 0 : i64, tpu.core_type = #tpu.core_type<tc>} {
    %c0 = arith.constant 0 : index
    %c0_0 = arith.constant 0 : index
    %0 = vector.load %arg0[%c0, %c0_0] : memref<8x128xf32, #tpu.memory_space<vmem>>, vector<8x128xf32>
    %c0_1 = arith.constant 0 : index
    %c0_2 = arith.constant 0 : index
    %1 = vector.load %arg1[%c0_1, %c0_2] : memref<8x128xf32, #tpu.memory_space<vmem>>, vector<8x128xf32>
    %cst = arith.constant dense<0.000000e+00> : vector<8x8xf32>
    %2 = tpu.matmul %0, %1, %cst {dimension_numbers = #tpu.dot_dimension_numbers<[1], [1], [0], [0], [0, 0, 1, 0], [], []>, precision = #tpu.contract_precision<fp32>} : vector<8x128xf32>, vector<8x128xf32>, vector<8x8xf32> -> vector<8x8xf32>
    %c0_3 = arith.constant 0 : index
    %c0_4 = arith.constant 0 : index
    %3 = vector.load %arg2[%c0_3, %c0_4] : memref<8x8xf32, #tpu.memory_space<vmem>>, vector<8x8xf32>
    tpu.vector_store %arg2[%c0_3, %c0_4], %2 {strides = array<i32>} : memref<8x8xf32, #tpu.memory_space<vmem>>, vector<8x8xf32>,
    return
  }
}

module attributes {stable_mosaic.version = 11 : i64} {
  func.func @_conv_mm_kernel(%arg0: i32, %arg1: i32, %arg2: memref<1x256x36xf32, #tpu.memory_space<vmem>>, %arg3: memref<8x36xf32, #tpu.memory_space<vmem>>, %arg4: memref<8x1xf32, #tpu.memory_space<vmem>>, %arg5: memref<1x8x256xf32, #tpu.memory_space<vmem>>) attributes {dimension_semantics = [#tpu.dimension_semantics<parallel>, #tpu.dimension_semantics<parallel>], iteration_bounds = array<i64: 2, 1>, scalar_prefetch = 0 : i64, scratch_operands = 0 : i64, tpu.core_type = #tpu.core_type<tc>, window_params = [{transform_indices = @transform_0, window_bounds = array<i64: 1, 256, 36>}, {pipeline_mode = #tpu.pipeline_mode<synchronous>, transform_indices = @transform_1, window_bounds = array<i64: 8, 36>}, {pipeline_mode = #tpu.pipeline_mode<synchronous>, transform_indices = @transform_2, window_bounds = array<i64: 8, 1>}, {transform_indices = @transform_3, window_bounds = array<i64: 1, 8, 256>}]} {
    %c0 = arith.constant 0 : index
    %c0_0 = arith.constant 0 : index
    %0 = vector.load %arg3[%c0, %c0_0] : memref<8x36xf32, #tpu.memory_space<vmem>>, vector<8x36xf32>
    %c0_1 = arith.constant 0 : index
    %c0_2 = arith.constant 0 : index
    %c0_3 = arith.constant 0 : index
    %1 = vector.load %arg2[%c0_1, %c0_2, %c0_3] : memref<1x256x36xf32, #tpu.memory_space<vmem>>, vector<1x256x36xf32>
    %2 = vector.shape_cast %1 : vector<1x256x36xf32> to vector<256x36xf32>
    %cst = arith.constant dense<0.000000e+00> : vector<8x256xf32>
    %3 = tpu.matmul %0, %2, %cst {dimension_numbers = #tpu.dot_dimension_numbers<[1], [1], [0], [0], [0, 0, 1, 0], [], []>} : vector<8x36xf32>, vector<256x36xf32>, vector<8x256xf32> -> vector<8x256xf32>
    %c0_4 = arith.constant 0 : index
    %c0_5 = arith.constant 0 : index
    %4 = vector.load %arg4[%c0_4, %c0_5] : memref<8x1xf32, #tpu.memory_space<vmem>>, vector<8x1xf32>
    %5 = vector.broadcast %4 : vector<8x1xf32> to vector<8x256xf32>
    %6 = arith.addf %3, %5 : vector<8x256xf32>
    %c0_6 = arith.constant 0 : index
    %c0_7 = arith.constant 0 : index
    %c0_8 = arith.constant 0 : index
    %7 = vector.load %arg5[%c0_6, %c0_7, %c0_8] : memref<1x8x256xf32, #tpu.memory_space<vmem>>, vector<1x8x256xf32>
    %8 = vector.shape_cast %7 : vector<1x8x256xf32> to vector<8x256xf32>
    %9 = vector.shape_cast %6 : vector<8x256xf32> to vector<1x8x256xf32>
    tpu.vector_store %arg5[%c0_6, %c0_7, %c0_8], %9 {strides = array<i32>} : memref<1x8x256xf32, #tpu.memory_space<vmem>>, vector<1x8x256xf32>,
    return
  }
  func.func @transform_0(%arg0: i32, %arg1: i32) -> (i32, i32, i32) {
    %c0_i32 = arith.constant 0 : i32
    %c0_i32_0 = arith.constant 0 : i32
    return %arg0, %arg1, %c0_i32 : i32, i32, i32
  }
  func.func @transform_1(%arg0: i32, %arg1: i32) -> (i32, i32) {
    %c0_i32 = arith.constant 0 : i32
    %c0_i32_0 = arith.constant 0 : i32
    %c0_i32_1 = arith.constant 0 : i32
    return %c0_i32, %c0_i32_0 : i32, i32
  }
  func.func @transform_2(%arg0: i32, %arg1: i32) -> (i32, i32) {
    %c0_i32 = arith.constant 0 : i32
    %c0_i32_0 = arith.constant 0 : i32
    %c0_i32_1 = arith.constant 0 : i32
    return %c0_i32, %c0_i32_0 : i32, i32
  }
  func.func @transform_3(%arg0: i32, %arg1: i32) -> (i32, i32, i32) {
    %c0_i32 = arith.constant 0 : i32
    %c0_i32_0 = arith.constant 0 : i32
    return %arg0, %c0_i32, %arg1 : i32, i32, i32
  }
}

</mosaic_0001>

<bundles_post_ra>
// kernel: tpu_custom_call.1
= control target key start
LH: loop header
LB: loop body
LE: loop exit
PB: predicated region body
PF: predicated region fallthrough
CT: control target
= control target key end

     0   :  { %7 = vsyncpa [#allocation3], 0  ;;  %s316_s0 = inlined_call_operand.hbm [shape: f32[8,128], index: 0, kind: input, shape index: {}]   ;;  %s317_s1 = inlined_call_operand.hbm [shape: f32[8,128], index: 1, kind: input, shape index: {}]   ;;  %s318_s2 = inlined_call_operand.hbm [shape: f32[8,8], index: 2, kind: output, shape index: {}]  }
   0x1   :  { %8 = vsyncpa [#allocation6], 0 }
   0x2   :  { %9 = vsyncpa [#allocation4], 0  ;;  %s15_s11 = sshll.u32 %s316_s0, 4  ;;  %s289_s12 = smov [#allocation2]   ;;  %s16_s11 = int_to_ptr.hbm [resolvable:$true] %s15_s11 }
   0x3   :  { %s17_s13 = sshll.u32 %s289_s12, 4  ;;  %s26_s16 = sshll.u32 %s317_s1, 4  ;;  %s18_s13 = int_to_ptr.vmem [resolvable:$true] %s17_s13  ;;  %s27_s16 = int_to_ptr.hbm [resolvable:$true] %s26_s16 }
   0x4   :  { %20 = dma.hbm_to_vmem [thread:$0]  %s16_s11, 128, %s18_s13, [#allocation3]  }
   0x5   :  { %s290_s17 = smov [#allocation5]  }
   0x6   :  { %s28_s18 = sshll.u32 %s290_s17, 4  ;;  %s29_s18 = int_to_ptr.vmem [resolvable:$true] %s28_s18 }
   0x7   :  { %31 = dma.hbm_to_vmem [thread:$0]  %s27_s16, 128, %s29_s18, [#allocation6]  }
   0x8   :  { %283 = dma.done.wait [#allocation3], 128  }
   0x9   :  { %284 = vsyncadd [#allocation3], 4294967168 }
   0xa   :  { %285 = dma.done.wait [#allocation6], 128  }
   0xb   :  { %286 = vsyncadd [#allocation6], 4294967168  ;;  %v41_v0 = vld [vmem:[#allocation5] sm:$0xff]  ;;  %v40_v1 = vld [vmem:[#allocation2] sm:$0xff]  ;;  %s291_s0 = smov [#allocation7]   ;;  %s197_s21 = sshll.u32 %s318_s2, 4  ;;  %s198_s21 = int_to_ptr.hbm [resolvable:$true] %s197_s21 }
   0xc   :  { %v57_v2 = vand.u32 4294901760, %v41_v0  ;;  %v59_v3 = vand.u32 4294901760, %v40_v1  ;;  %s195_s1 = sshll.u32 %s291_s0, 4  ;;  %vm188_vm0 = vcmask 64512   ;;  %s196_s1 = int_to_ptr.vmem [resolvable:$true] %s195_s1 }
   0xe   :  { %v84_v4 = vsub.f32 %v41_v0, %v57_v2  ;;  %58 = vmatpush.xpose.msra.mxu0 %v57_v2  ;;  %134 = vmatpush.xpose.msra.mxu3 %v57_v2  ;;  %v60_v5 = vsub.f32 %v40_v1, %v59_v3 }
  0x10   :  { %111 = vmatpush.xpose.msra.mxu2 %v84_v4  ;;  %v85_v6 = vand.u32 4294901760, %v84_v4  ;;  %v61_v7 = vand.u32 4294901760, %v60_v5 }
  0x12   :  { %v86_v8 = vsub.f32 %v84_v4, %v85_v6  ;;  %v62_v9 = vsub.f32 %v60_v5, %v61_v7  ;;  %138 = vmatmul.f32.vlgmr.msra.gmra.mxu3 %v61_v7  ;;  %160 = vmatpush.xpose.msrb.mxu0 %v85_v6 }
  0x13   :  { %114 = vmatmul.f32.vlgmr.msra.gmra.mxu2 %v60_v5 }
  0x14   :  { %v87_v10 = vand.u32 4294901760, %v86_v8  ;;  %v63_v11 = vand.u32 4294901760, %v62_v9 }
  0x16   :  { %88 = vmatpush.xpose.msra.mxu1 %v87_v10  ;;  %64 = vmatmul.f32.vlgmr.msra.gmra.mxu0 %v63_v11 }
  0x19   :  { %90 = vmatmul.f32.vlgmr.msra.gmra.mxu1 %v59_v3 }
  0x1a   :  { %182 = vmatpush.xpose.msrb.mxu1 %v57_v2 }
  0x1e   :  { %162 = vmatmul.f32.vlgmr.msrb.gmra.mxu0 %v59_v3 }
  0x21   :  { %184 = vmatmul.f32.vlgmr.msrb.gmra.mxu1 %v59_v3 }
  0x93   :  { %v65_v12 = vpop.f32.mrf.mxu0 }
  0x95   :  { %v139_v16 = vpop.f32.mrf.mxu3 }
  0x96   :  { %v91_v13 = vpop.f32.mrf.mxu1  ;;  %v115_v14 = vpop.f32.mrf.mxu2 }
  0x97   :  { %v92_v15 = vadd.f32 %v91_v13, %v65_v12 }
  0x99   :  { %v116_v17 = vadd.f32 %v115_v14, %v92_v15 }
  0x9b   :  { %v140_v18 = vadd.f32 %v139_v16, %v116_v17  ;;  %v163_v19 = vpop.f32.mrf.mxu0 }
  0x9d   :  { %v164_v20 = vadd.f32 %v163_v19, %v140_v18 }
  0x9e   :  { %v185_v21 = vpop.f32.mrf.mxu1 }
  0x9f   :  { %v186_v22 = vadd.f32 %v185_v21, %v164_v20 }
  0xa1   :  { %189 = vst.msk [vmem:[#allocation7] sm:$0xff] %vm188_vm0, %v186_v22 }
  0xa2   :  { %200 = dma.vmem_to_hbm [thread:$0]  %s196_s1, 128, %s198_s21, [#allocation4]  }
  0xa3   :  { %287 = dma.done.wait [#allocation4], 128  }
  0xa4   :  { %288 = vsyncadd [#allocation4], 4294967168 }
  0xa5   :  { %205 = vsyncpa [#allocation3], 1 }
  0xa6   :  { %206 = vsyncpa [#allocation6], 1 }
  0xa7   :  { %207 = vsyncpa [#allocation4], 1 }

// kernel: tpu_custom_call.1
= control target key start
LH: loop header
LB: loop body
LE: loop exit
PB: predicated region body
PF: predicated region fallthrough
CT: control target
= control target key end

     0   :  { %8 = vsyncpa [#allocation3], 0  ;;  %s854_s0 = inlined_call_operand.vmem [shape: f32[2,256,36], index: 0, kind: input, shape index: {}]   ;;  %s855_s1 = inlined_call_operand.vmem [shape: f32[8,36], index: 1, kind: input, shape index: {}]   ;;  %s856_s2 = inlined_call_operand.vmem [shape: f32[8,1], index: 2, kind: input, shape index: {}]   ;;  %s857_s3 = inlined_call_operand.hbm [shape: f32[2,8,256], index: 3, kind: output, shape index: {}]  }
   0x1   :  { %10 = vsyncpa [#allocation3 + $0x1], 0  ;;  %s683_s12 = smov 0   ;;  %s685_s13 = smov 0  }
   0x2   :  { %s687_s14 = smov 0   ;;  %s689_s15 = smov 0  }
   0x3   :  { %s691_s16 = smov 0   ;;  %s693_s17 = smov 0  }
   0x4 LB: > { %s476_s18 = sadd.s32 4294967295, %s660_s17   ;;  %s477_s19 = sadd.s32 4294967294, %s660_s17   ;;  %s660_s17 = sphi %s693_s17, %s16_s17   ;;  %s656_s16 = sphi %s691_s16, %s864_s16   ;;  %s652_s15 = sphi %s689_s15, %s863_s15   ;;  %s648_s14 = sphi %s687_s14, %s862_s14   ;;  %s644_s13 = sphi %s685_s13, %s861_s13   ;;  %s640_s12 = sphi %s683_s12, %s860_s12  }
   0x5   : > { %s28_s20 = sadd.s32 1, %s656_s16  ;;  %s107_s21 = sadd.s32 1, %s648_s14 }
   0x6   : > { %p30_p0 = scmp.ge.s32.totalorder %s28_s20, 2  ;;  %p117_p1 = scmp.ne.s32.totalorder %s648_s14, %s644_s13 }
   0x7   : > { %p118_p2 = scmp.eq.s32.totalorder %s476_s18, 1  ;;  %p123_p3 = scmp.ne.s32.totalorder %s644_s13, %s640_s12 }
   0x8   : > { %s866_s20 = smov (%p30_p0, %s28_s20), 0  ;;  %p124_p5 = scmp.eq.s32.totalorder %s477_s19, 1 }
   0x9   : > { %p723_p4 = por %p118_p2, %p117_p1  ;;  %s102_s23 = ssub.s32 %s656_s16, %s866_s20 }
   0xa   : > { %p480_p6 = scmp.ge.s32.totalorder %s660_s17, 1  ;;  %p105_p7 = scmp.eq.s32.totalorder %s102_s23, 0 }
   0xb   : > { %p730_p8 = por %p124_p5, %p123_p3  ;;  %p161_p9 = scmp.lt.s32.totalorder %s660_s17, 3 }
   0xc   : > { %s736_s25 = scalar_select %p105_p7, %s648_s14, %s107_s21  }
   0xd   : > { %p162_p10 = pnand %p480_p6, %p161_p9 }
   0xe   : > { %p190_p11 = scmp.lt.s32.totalorder (!%p162_p10), %s652_s15, 1  ;;  %s186_s8 = sand.u32 (!%p162_p10), 1, %s644_s13  }
   0xf   : > { %165 = sbr.rel (%p162_p10) target bundleno = 220 (0xdc), region = 32  ;;  %s481_s9 = sshll.u32 (!%p162_p10), %s186_s8, 4 }
  0x10   : > { %s524_s10 = sshll.u32 (!%p162_p10), %s652_s15, 4  ;;  %s188_s21 = scalar_lea.vmem (!%p162_p10), [#allocation2], %s481_s9 }
  0x11   : > { %s395_s19 = scalar_lea.hbm (!%p162_p10), %s857_s3, %s524_s10  ;;  %s397_s23 = sshll.u32 (!%p162_p10), %s188_s21, 4  ;;  %s398_s23 = int_to_ptr.vmem [resolvable:$true] %s397_s23 }
  0x12   : > { %s602_s4 = scalar_lea.hbm (!%p162_p10), %s857_s3, 32 }
  0x14   : > { %s191_s26 = scalar_select %p190_p11, %s652_s15, 1  ;;  %vm239_vm0 = vcmask 293888   ;;  %v233_v18 = vld [vmem:[%s856_s2] sm:$0xff]  ;;  %v662_v21 = vmov 0  }
  0x15   : > { %581 = vset.pattern.permute.xlu0 %v662_v21  ;;  %v200_v34 = vld [vmem:[%s855_s1] sm:$0xff] }
  0x16   : > { %s523_s27 = sshll.u32 %s191_s26, 8  ;;  %236 = vperm.xlu0 %581, %v233_v18   ;;  %s399_s26 = sshll.u32 %s395_s19, 4  ;;  %s400_s26 = int_to_ptr.hbm [resolvable:$true] %s399_s26 }
  0x17   : > { %s743_s30 = scalar_lea.vmem %s854_s0, %s523_s27  ;;  %s382_s27 = scalar_lea.sflag [#allocation3], %s186_s8 }
  0x18   : > { %v216_v0 = vld [vmem:[%s743_s30 + $0x78] sm:$0xff]  ;;  %v215_v2 = vld [vmem:[%s743_s30 + $0x70] sm:$0xff]  ;;  %v214_v4 = vld [vmem:[%s743_s30 + $0x68] sm:$0xff]  ;;  %s596_s28 = sshra.s32 %s400_s26, 4  ;;  %s597_s28 = int_to_ptr.hbm [resolvable:$true] %s596_s28 }
  0x19   : > { %v232_v1 = vld [vmem:[%s743_s30 + $0xf8] sm:$0xff]  ;;  %484 = vmatpush.xpose.msk.msra.mxu0 %vm239_vm0, %v216_v0  ;;  %v231_v3 = vld [vmem:[%s743_s30 + $0xf0] sm:$0xff]  ;;  %v230_v5 = vld [vmem:[%s743_s30 + $0xe8] sm:$0xff]  ;;  %s598_s15 = scalar_lea.hbm %s597_s28, 16  ;;  %p603_p1 = scmp.lt.s32.totalorder %s597_s28, %s857_s3 }
  0x1a   : > { %501 = vmatpush.xpose.msk.msra.mxu1 %vm239_vm0, %v232_v1  ;;  %v213_v6 = vld [vmem:[%s743_s30 + $0x60] sm:$0xff]  ;;  %v212_v8 = vld [vmem:[%s743_s30 + $0x58] sm:$0xff]  ;;  %v211_v10 = vld [vmem:[%s743_s30 + $0x50] sm:$0xff]  ;;  %p599_p12 = scmp.ne.s32.totalorder %s597_s28, %s598_s15  ;;  %p604_p2 = scmp.lt.s32.totalorder %s602_s4, %s598_s15 }
  0x1b   : > { %v229_v7 = vld [vmem:[%s743_s30 + $0xe0] sm:$0xff]  ;;  %v228_v9 = vld [vmem:[%s743_s30 + $0xd8] sm:$0xff]  ;;  %v227_v11 = vld [vmem:[%s743_s30 + $0xd0] sm:$0xff] }
  0x1c   : > { %v210_v12 = vld [vmem:[%s743_s30 + $0x48] sm:$0xff]  ;;  %v209_v14 = vld [vmem:[%s743_s30 + $0x40] sm:$0xff]  ;;  %v208_v16 = vld [vmem:[%s743_s30 + $0x38] sm:$0xff]  ;;  %p600_p13 = pnand %p599_p12, %p723_p4  ;;  %p605_p3 = por %p604_p2, %p603_p1 }
  0x1d   : > { %485 = vmatpush.xpose.msk.msra.mxu0 %vm239_vm0, %v215_v2  ;;  %v226_v13 = vld [vmem:[%s743_s30 + $0xc8] sm:$0xff]  ;;  %v225_v15 = vld [vmem:[%s743_s30 + $0xc0] sm:$0xff]  ;;  %v224_v17 = vld [vmem:[%s743_s30 + $0xb8] sm:$0xff] }
  0x1e   : > { %502 = vmatpush.xpose.msk.msra.mxu1 %vm239_vm0, %v231_v3  ;;  %v207_v19 = vld [vmem:[%s743_s30 + $0x30] sm:$0xff]  ;;  %v206_v22 = vld [vmem:[%s743_s30 + $0x28] sm:$0xff]  ;;  %v205_v24 = vld [vmem:[%s743_s30 + $0x20] sm:$0xff]  ;;  %p601_p0 = pneg %p600_p13 }
  0x1f   : > { %v223_v20 = vld [vmem:[%s743_s30 + $0xb0] sm:$0xff]  ;;  %v222_v23 = vld [vmem:[%s743_s30 + $0xa8] sm:$0xff]  ;;  %v221_v25 = vld [vmem:[%s743_s30 + $0xa0] sm:$0xff] }
  0x20   : > { %v204_v26 = vld [vmem:[%s743_s30 + $0x18] sm:$0xff]  ;;  %v203_v28 = vld [vmem:[%s743_s30 + $0x10] sm:$0xff]  ;;  %v202_v30 = vld [vmem:[%s743_s30 + $0x8] sm:$0xff]  ;;  %p606_p5 = pnand %p605_p3, %p601_p0 }
  0x21   : > { %486 = vmatpush.xpose.msk.msra.mxu0 %vm239_vm0, %v214_v4  ;;  %v220_v27 = vld [vmem:[%s743_s30 + $0x98] sm:$0xff]  ;;  %v219_v29 = vld [vmem:[%s743_s30 + $0x90] sm:$0xff]  ;;  %v218_v31 = vld [vmem:[%s743_s30 + $0x88] sm:$0xff] }
  0x22   : > { %503 = vmatpush.xpose.msk.msra.mxu1 %vm239_vm0, %v230_v5  ;;  %v201_v32 = vld [vmem:[%s743_s30] sm:$0xff] }
  0x23   : > { %v217_v33 = vld [vmem:[%s743_s30 + $0x80] sm:$0xff] }
  0x25   : > { %487 = vmatpush.xpose.msk.msra.mxu0 %vm239_vm0, %v213_v6 }
  0x26   : > { %504 = vmatpush.xpose.msk.msra.mxu1 %vm239_vm0, %v229_v7 }
  0x29   : > { %488 = vmatpush.xpose.msk.msra.mxu0 %vm239_vm0, %v212_v8 }
  0x2a   : > { %505 = vmatpush.xpose.msk.msra.mxu1 %vm239_vm0, %v228_v9 }
  0x2d   : > { %489 = vmatpush.xpose.msk.msra.mxu0 %vm239_vm0, %v211_v10 }
  0x2e   : > { %506 = vmatpush.xpose.msk.msra.mxu1 %vm239_vm0, %v227_v11 }
  0x31   : > { %490 = vmatpush.xpose.msk.msra.mxu0 %vm239_vm0, %v210_v12 }
  0x32   : > { %507 = vmatpush.xpose.msk.msra.mxu1 %vm239_vm0, %v226_v13 }
  0x35   : > { %491 = vmatpush.xpose.msk.msra.mxu0 %vm239_vm0, %v209_v14 }
  0x36   : > { %508 = vmatpush.xpose.msk.msra.mxu1 %vm239_vm0, %v225_v15 }
  0x39   : > { %492 = vmatpush.xpose.msk.msra.mxu0 %vm239_vm0, %v208_v16 }
  0x3a   : > { %509 = vmatpush.xpose.msk.msra.mxu1 %vm239_vm0, %v224_v17 }
  0x3d   : > { %493 = vmatpush.xpose.msk.msra.mxu0 %vm239_vm0, %v207_v19 }
  0x3e   : > { %510 = vmatpush.xpose.msk.msra.mxu1 %vm239_vm0, %v223_v20 }
  0x41   : > { %494 = vmatpush.xpose.msk.msra.mxu0 %vm239_vm0, %v206_v22 }
  0x42   : > { %511 = vmatpush.xpose.msk.msra.mxu1 %vm239_vm0, %v222_v23 }
  0x45   : > { %495 = vmatpush.xpose.msk.msra.mxu0 %vm239_vm0, %v205_v24 }
  0x46   : > { %512 = vmatpush.xpose.msk.msra.mxu1 %vm239_vm0, %v221_v25 }
  0x49   : > { %496 = vmatpush.xpose.msk.msra.mxu0 %vm239_vm0, %v204_v26 }
  0x4a   : > { %513 = vmatpush.xpose.msk.msra.mxu1 %vm239_vm0, %v220_v27 }
  0x4d   : > { %497 = vmatpush.xpose.msk.msra.mxu0 %vm239_vm0, %v203_v28 }
  0x4e   : > { %514 = vmatpush.xpose.msk.msra.mxu1 %vm239_vm0, %v219_v29 }
  0x51   : > { %498 = vmatpush.xpose.msk.msra.mxu0 %vm239_vm0, %v202_v30 }
  0x52   : > { %515 = vmatpush.xpose.msk.msra.mxu1 %vm239_vm0, %v218_v31 }
  0x55   : > { %499 = vmatpush.xpose.msk.msra.mxu0 %vm239_vm0, %v201_v32 }
  0x56   : > { %516 = vmatpush.xpose.msk.msra.mxu1 %vm239_vm0, %v217_v33 }
  0x58   : > { %500 = vmatmul.msk.f32.vlgmr.msra.gmra.mxu0 %vm239_vm0, %v200_v34 }
  0x59   : > { %517 = vmatmul.msk.f32.vlgmr.msra.gmra.mxu1 %vm239_vm0, %v200_v34 }
  0x88   : > { %v237_v35 = vpop.permute.xlu0 %236 }
  0xd5   : > { %v356_v36 = vpop.f32.mrf.mxu0 }
  0xd6   : > { %v376_v37 = vpop.f32.mrf.mxu1  ;;  %v357_v38 = vadd.f32 %v356_v36, %v237_v35 }
  0xd7   : > { %v377_v39 = vadd.f32 %v376_v37, %v237_v35 }
  0xd8   : > { %379 = vst [vmem:[%s188_s21] sm:$0xff] %v357_v38 }
  0xd9   : > { %380 = vst [vmem:[%s188_s21 + $0x8] sm:$0xff] %v377_v39 }
  0xda   : > { %609 = shalt.err (!%p606_p5)
}
  0xdb   : > { %525 = dma.vmem_to_hbm [thread:$0]  (%p723_p4), %s398_s23, 256, %s400_s26, %s382_s27  }
  0xdc PF: > { %p531_p6 = scmp.ge.s32.totalorder %s660_s17, 2  ;;  %s411_s7 = sand.u32 1, %s640_s12  }
  0xdd   : > { %s412_s8 = scalar_lea.sflag [#allocation3], %s411_s7 }
  0xde   : > { %p528_p7 = pnand %p531_p6, %p730_p8 }
  0xe0   : > { %p529_p9 = pneg %p528_p7 }
  0xe2   : > { %635 = dma.done.wait (%p529_p9), %s412_s8, 256  }
  0xe3   : > { %637 = vsyncadd (%p529_p9), %s412_s8, 4294967040  ;;  %s16_s17 = sadd.s32 1, %s660_s17   ;;  %s860_s12 = smov %s644_s13 }
  0xe4   : > { %p13_p10 = scmp.ge.s32.totalorder %s16_s17, 4   ;;  %s861_s13 = smov %s648_s14 }
  0xe5   : > { %s862_s14 = smov %s736_s25  ;;  %s863_s15 = smov %s656_s16 }
  0xe6   : > { %s864_s16 = smov %s866_s20  ;;  %15 = sbr.rel (!%p13_p10) target bundleno = 4 (0x4), region = 67 }
  0xeb   :  { %418 = vsyncpa [#allocation3], 1 }
  0xec   :  { %420 = vsyncpa [#allocation3 + $0x1], 1 }

</bundles_post_ra>
